<compile_context>
chip_gen: v6e
topology: v6e:2x2x1
jax: 0.10.0
libtpu: 0.0.40
codegen_flags: <defaults>
</compile_context>

<pallas_src>
import jax
import jax.numpy as jnp
from jax.experimental import pallas as pl
from jax.experimental.pallas import tpu as pltpu

_LANE = 128                       # lane padding for hidden / output widths
_VMEM_BUDGET = 40 * 1024 * 1024   # conservative tile budget (ok on v7x 64MiB)


def _round_up(v, m):
    return (v + m - 1) // m * m


def _mlp_kernel(x_ref, w1_ref, b1_ref, w2_ref, b2_ref, w3_ref, b3_ref,
                w4_ref, b4_ref, o_ref):
    """One grid step = one batch tile. All weights are VMEM-resident
    (constant index_maps); only the x tile streams from HBM.

    Matmul operands are bf16 (f32 MXU accumulation); bias adds and ReLU are
    kept in f32 (v5e's VPU has no bf16)."""
    x = x_ref[...].astype(jnp.bfloat16)
    h = jnp.dot(x, w1_ref[...], preferred_element_type=jnp.float32)
    h = jnp.maximum(h + b1_ref[...], 0.0)
    h = jnp.dot(h.astype(jnp.bfloat16), w2_ref[...],
                preferred_element_type=jnp.float32)
    h = jnp.maximum(h + b2_ref[...], 0.0)
    h = jnp.dot(h.astype(jnp.bfloat16), w3_ref[...],
                preferred_element_type=jnp.float32)
    h = jnp.maximum(h + b3_ref[...], 0.0)
    out = jnp.dot(h.astype(jnp.bfloat16), w4_ref[...],
                  preferred_element_type=jnp.float32) + b4_ref[...]
    o_ref[...] = out.astype(o_ref.dtype)


def pad_params(params, out_pad):
    """Zero-pad every layer width to the lane-padded size; store weights as
    bf16 (MXU operands), biases as f32. Padding is numerically exact."""
    f_in, h1 = params["w1"].shape
    p = {}
    p["w1"] = jnp.zeros((f_in, _LANE), jnp.float32).at[:, :h1].set(
        params["w1"]).astype(jnp.bfloat16)
    p["b1"] = jnp.zeros((1, _LANE), jnp.float32).at[:, :h1].set(params["b1"])
    for i, width in ((2, _LANE), (3, _LANE), (4, out_pad)):
        w = params[f"w{i}"]
        b = params[f"b{i}"]
        p[f"w{i}"] = jnp.zeros((_LANE, width), jnp.float32).at[
            :w.shape[0], :w.shape[1]].set(w).astype(jnp.bfloat16)
        p[f"b{i}"] = jnp.zeros((1, width), jnp.float32).at[:, :b.shape[1]].set(b)
    return p


def _choose_tiling(B, F, OP):
    """Pick the batch tile TM and padded batch Bp under a VMEM budget."""
    fixed = (F * _LANE * 2                 # resident bf16 w1
             + 2 * _LANE * _LANE * 2       # w2, w3 (bf16)
             + _LANE * OP * 2              # w4 (bf16)
             + (3 * _LANE + OP) * 4        # biases (f32)
             + (1 << 20))                  # slack for temporaries
    per_tm = 2 * 4 * (F + OP)              # double-buffered f32 x tile + out tile
    cap = (_VMEM_BUDGET - fixed) // per_tm
    cap = max(8, min(512, (cap // 8) * 8))

    Bp = _round_up(B, 8)
    tm = 8
    for cand in range(cap, 7, -8):         # largest multiple of 8 dividing Bp
        if Bp % cand == 0:
            tm = cand
            break
    if tm < min(cap, 128) and Bp >= 256:
        # best divisor is tiny but the batch is big: pad batch instead
        tm = min(cap, 256)
        Bp = _round_up(B, tm)
    if Bp // tm == 1 and tm % 16 == 0:
        tm //= 2                           # >=2 tiles -> both v7x TensorCores
    vmem_need = fixed + tm * per_tm
    return tm, Bp, vmem_need


def classifier_forward(x, params):
    """x: [B, input_size] f32; params: unpadded w1..w4 ([in,out]) / b1..b4
    ([1,out]). Returns [B, output_dim] f32 logits."""
    B, F = x.shape
    out_dim = params["w4"].shape[1]
    OP = _round_up(max(out_dim, 1), _LANE)

    p = pad_params(params, OP)
    TM, Bp, vmem_need = _choose_tiling(B, F, OP)

    # Only pad the batch (no dtype cast, no feature padding) and only when
    # needed; normally x is fed to the kernel untouched.
    x_in = x if Bp == B else jnp.zeros((Bp, F), x.dtype).at[:B].set(x)

    grid = (Bp // TM,)
    const = lambda i: (0, 0)
    in_specs = [
        pl.BlockSpec((TM, F), lambda i: (i, 0)),   # x tile (f32, pipelined)
        pl.BlockSpec((F, _LANE), const),           # w1 (bf16, VMEM-resident)
        pl.BlockSpec((1, _LANE), const),           # b1
        pl.BlockSpec((_LANE, _LANE), const),       # w2
        pl.BlockSpec((1, _LANE), const),           # b2
        pl.BlockSpec((_LANE, _LANE), const),       # w3
        pl.BlockSpec((1, _LANE), const),           # b3
        pl.BlockSpec((_LANE, OP), const),          # w4
        pl.BlockSpec((1, OP), const),              # b4
    ]
    out_spec = pl.BlockSpec((TM, OP), lambda i: (i, 0))

    flops = 2 * Bp * (F * _LANE + 2 * _LANE * _LANE + _LANE * OP)
    bytes_accessed = (Bp * F * 4                   # x read (f32, once)
                      + F * _LANE * 2              # w1 read (bf16, once)
                      + 2 * _LANE * _LANE * 2 + _LANE * OP * 2
                      + (3 * _LANE + OP) * 4
                      + Bp * OP * 4)               # logits write

    out_padded = pl.pallas_call(
        _mlp_kernel,
        out_shape=jax.ShapeDtypeStruct((Bp, OP), jnp.float32),
        grid_spec=pltpu.PrefetchScalarGridSpec(
            num_scalar_prefetch=0,
            grid=grid,
            in_specs=in_specs,
            out_specs=out_spec),
        compiler_params=pltpu.CompilerParams(
            dimension_semantics=("parallel",),
            vmem_limit_bytes=int(min(100 << 20,
                                     max(32 << 20, vmem_need + (4 << 20))))),
        cost_estimate=pl.CostEstimate(
            flops=flops, transcendentals=0, bytes_accessed=bytes_accessed),
    )(x_in, p["w1"], p["b1"], p["w2"], p["b2"], p["w3"], p["b3"],
      p["w4"], p["b4"])

    return out_padded[:B, :out_dim]


def init_params(key, input_size, output_dim):
    """Mirrors torch.nn.Linear default init U(-1/sqrt(fan_in), +); weights
    stored as [in, out] so the kernel computes x @ W + b."""
    dims = [input_size, 100, 50, 25, output_dim]
    params = {}
    for i in range(4):
        fan_in, fan_out = dims[i], dims[i + 1]
        key, kw, kb = jax.random.split(key, 3)
        bound = 1.0 / jnp.sqrt(jnp.float32(fan_in))
        params[f"w{i+1}"] = jax.random.uniform(
            kw, (fan_in, fan_out), jnp.float32, -bound, bound)
        params[f"b{i+1}"] = jax.random.uniform(
            kb, (1, fan_out), jnp.float32, -bound, bound)
    return params


def reference_forward(x, params):
    """Pure-JAX reference mirroring the kernel's bf16 operand rounding
    (f32 accumulation, f32 bias add + ReLU)."""
    def bdot(a, w):
        return jnp.dot(a.astype(jnp.bfloat16), w.astype(jnp.bfloat16),
                       preferred_element_type=jnp.float32)
    h = jnp.maximum(bdot(x, params["w1"]) + params["b1"], 0.0)
    h = jnp.maximum(bdot(h, params["w2"]) + params["b2"], 0.0)
    h = jnp.maximum(bdot(h, params["w3"]) + params["b3"], 0.0)
    return bdot(h, params["w4"]) + params["b4"]


if __name__ == "__main__":
    key = jax.random.PRNGKey(0)
    batch = 8
    input_size = 32     # num features (genes)
    output_dim = 8      # num classes

    kx, kp = jax.random.split(key)
    x = jax.random.normal(kx, (batch, input_size), jnp.float32)
    params = init_params(kp, input_size, output_dim)

    out = jax.block_until_ready(classifier_forward(x, params))

    ref = reference_forward(x, params)
    assert out.shape == (batch, output_dim)
    assert jnp.allclose(out, ref, atol=2e-2, rtol=2e-2), (
        float(jnp.max(jnp.abs(out - ref))))

    print("KERNEL_OK")
</pallas_src>

<mosaic_0001>
module attributes {stable_mosaic.version = 11 : i64} {
  func.func @_mlp_kernel(%arg0: i32, %arg1: memref<8x32xf32, #tpu.memory_space<vmem>>, %arg2: memref<32x128xbf16, #tpu.memory_space<vmem>>, %arg3: memref<1x128xf32, #tpu.memory_space<vmem>>, %arg4: memref<128x128xbf16, #tpu.memory_space<vmem>>, %arg5: memref<1x128xf32, #tpu.memory_space<vmem>>, %arg6: memref<128x128xbf16, #tpu.memory_space<vmem>>, %arg7: memref<1x128xf32, #tpu.memory_space<vmem>>, %arg8: memref<128x128xbf16, #tpu.memory_space<vmem>>, %arg9: memref<1x128xf32, #tpu.memory_space<vmem>>, %arg10: memref<8x128xf32, #tpu.memory_space<vmem>>) attributes {dimension_semantics = [#tpu.dimension_semantics<parallel>], iteration_bounds = array<i64: 1>, scalar_prefetch = 0 : i64, scratch_operands = 0 : i64, tpu.core_type = #tpu.core_type<tc>, window_params = [{transform_indices = @transform_0, window_bounds = array<i64: 8, 32>}, {pipeline_mode = #tpu.pipeline_mode<synchronous>, transform_indices = @transform_1, window_bounds = array<i64: 32, 128>}, {pipeline_mode = #tpu.pipeline_mode<synchronous>, transform_indices = @transform_2, window_bounds = array<i64: 1, 128>}, {pipeline_mode = #tpu.pipeline_mode<synchronous>, transform_indices = @transform_3, window_bounds = array<i64: 128, 128>}, {pipeline_mode = #tpu.pipeline_mode<synchronous>, transform_indices = @transform_4, window_bounds = array<i64: 1, 128>}, {pipeline_mode = #tpu.pipeline_mode<synchronous>, transform_indices = @transform_5, window_bounds = array<i64: 128, 128>}, {pipeline_mode = #tpu.pipeline_mode<synchronous>, transform_indices = @transform_6, window_bounds = array<i64: 1, 128>}, {pipeline_mode = #tpu.pipeline_mode<synchronous>, transform_indices = @transform_7, window_bounds = array<i64: 128, 128>}, {pipeline_mode = #tpu.pipeline_mode<synchronous>, transform_indices = @transform_8, window_bounds = array<i64: 1, 128>}, {transform_indices = @transform_9, window_bounds = array<i64: 8, 128>}]} {
    %c0 = arith.constant 0 : index
    %c0_0 = arith.constant 0 : index
    %0 = vector.load %arg1[%c0, %c0_0] : memref<8x32xf32, #tpu.memory_space<vmem>>, vector<8x32xf32>
    %1 = arith.truncf %0 : vector<8x32xf32> to vector<8x32xbf16>
    %c0_1 = arith.constant 0 : index
    %c0_2 = arith.constant 0 : index
    %2 = vector.load %arg2[%c0_1, %c0_2] : memref<32x128xbf16, #tpu.memory_space<vmem>>, vector<32x128xbf16>
    %cst = arith.constant dense<0.000000e+00> : vector<8x128xf32>
    %3 = tpu.matmul %1, %2, %cst {dimension_numbers = #tpu.dot_dimension_numbers<[1], [0], [0], [1], [0, 0, 1, 1], [], []>} : vector<8x32xbf16>, vector<32x128xbf16>, vector<8x128xf32> -> vector<8x128xf32>
    %c0_3 = arith.constant 0 : index
    %c0_4 = arith.constant 0 : index
    %4 = vector.load %arg3[%c0_3, %c0_4] : memref<1x128xf32, #tpu.memory_space<vmem>>, vector<1x128xf32>
    %5 = vector.broadcast %4 : vector<1x128xf32> to vector<8x128xf32>
    %6 = arith.addf %3, %5 : vector<8x128xf32>
    %cst_5 = arith.constant 0.000000e+00 : f32
    %7 = vector.broadcast %cst_5 : f32 to vector<8x128xf32>
    %8 = arith.maximumf %6, %7 : vector<8x128xf32>
    %9 = arith.truncf %8 : vector<8x128xf32> to vector<8x128xbf16>
    %c0_6 = arith.constant 0 : index
    %c0_7 = arith.constant 0 : index
    %10 = vector.load %arg4[%c0_6, %c0_7] : memref<128x128xbf16, #tpu.memory_space<vmem>>, vector<128x128xbf16>
    %cst_8 = arith.constant dense<0.000000e+00> : vector<8x128xf32>
    %11 = tpu.matmul %9, %10, %cst_8 {dimension_numbers = #tpu.dot_dimension_numbers<[1], [0], [0], [1], [0, 0, 1, 1], [], []>} : vector<8x128xbf16>, vector<128x128xbf16>, vector<8x128xf32> -> vector<8x128xf32>
    %c0_9 = arith.constant 0 : index
    %c0_10 = arith.constant 0 : index
    %12 = vector.load %arg5[%c0_9, %c0_10] : memref<1x128xf32, #tpu.memory_space<vmem>>, vector<1x128xf32>
    %13 = vector.broadcast %12 : vector<1x128xf32> to vector<8x128xf32>
    %14 = arith.addf %11, %13 : vector<8x128xf32>
    %cst_11 = arith.constant 0.000000e+00 : f32
    %15 = vector.broadcast %cst_11 : f32 to vector<8x128xf32>
    %16 = arith.maximumf %14, %15 : vector<8x128xf32>
    %17 = arith.truncf %16 : vector<8x128xf32> to vector<8x128xbf16>
    %c0_12 = arith.constant 0 : index
    %c0_13 = arith.constant 0 : index
    %18 = vector.load %arg6[%c0_12, %c0_13] : memref<128x128xbf16, #tpu.memory_space<vmem>>, vector<128x128xbf16>
    %cst_14 = arith.constant dense<0.000000e+00> : vector<8x128xf32>
    %19 = tpu.matmul %17, %18, %cst_14 {dimension_numbers = #tpu.dot_dimension_numbers<[1], [0], [0], [1], [0, 0, 1, 1], [], []>} : vector<8x128xbf16>, vector<128x128xbf16>, vector<8x128xf32> -> vector<8x128xf32>
    %c0_15 = arith.constant 0 : index
    %c0_16 = arith.constant 0 : index
    %20 = vector.load %arg7[%c0_15, %c0_16] : memref<1x128xf32, #tpu.memory_space<vmem>>, vector<1x128xf32>
    %21 = vector.broadcast %20 : vector<1x128xf32> to vector<8x128xf32>
    %22 = arith.addf %19, %21 : vector<8x128xf32>
    %cst_17 = arith.constant 0.000000e+00 : f32
    %23 = vector.broadcast %cst_17 : f32 to vector<8x128xf32>
    %24 = arith.maximumf %22, %23 : vector<8x128xf32>
    %25 = arith.truncf %24 : vector<8x128xf32> to vector<8x128xbf16>
    %c0_18 = arith.constant 0 : index
    %c0_19 = arith.constant 0 : index
    %26 = vector.load %arg8[%c0_18, %c0_19] : memref<128x128xbf16, #tpu.memory_space<vmem>>, vector<128x128xbf16>
    %cst_20 = arith.constant dense<0.000000e+00> : vector<8x128xf32>
    %27 = tpu.matmul %25, %26, %cst_20 {dimension_numbers = #tpu.dot_dimension_numbers<[1], [0], [0], [1], [0, 0, 1, 1], [], []>} : vector<8x128xbf16>, vector<128x128xbf16>, vector<8x128xf32> -> vector<8x128xf32>
    %c0_21 = arith.constant 0 : index
    %c0_22 = arith.constant 0 : index
    %28 = vector.load %arg9[%c0_21, %c0_22] : memref<1x128xf32, #tpu.memory_space<vmem>>, vector<1x128xf32>
    %29 = vector.broadcast %28 : vector<1x128xf32> to vector<8x128xf32>
    %30 = arith.addf %27, %29 : vector<8x128xf32>
    %c0_23 = arith.constant 0 : index
    %c0_24 = arith.constant 0 : index
    %31 = vector.load %arg10[%c0_23, %c0_24] : memref<8x128xf32, #tpu.memory_space<vmem>>, vector<8x128xf32>
    tpu.vector_store %arg10[%c0_23, %c0_24], %30 {strides = array<i32>} : memref<8x128xf32, #tpu.memory_space<vmem>>, vector<8x128xf32>,
    return
  }
  func.func @transform_0(%arg0: i32) -> (i32, i32) {
    %c0_i32 = arith.constant 0 : i32
    %c0_i32_0 = arith.constant 0 : i32
    return %arg0, %c0_i32 : i32, i32
  }
  func.func @transform_1(%arg0: i32) -> (i32, i32) {
    %c0_i32 = arith.constant 0 : i32
    %c0_i32_0 = arith.constant 0 : i32
    %c0_i32_1 = arith.constant 0 : i32
    return %c0_i32, %c0_i32_0 : i32, i32
  }
  func.func @transform_2(%arg0: i32) -> (i32, i32) {
    %c0_i32 = arith.constant 0 : i32
    %c0_i32_0 = arith.constant 0 : i32
    %c0_i32_1 = arith.constant 0 : i32
    return %c0_i32, %c0_i32_0 : i32, i32
  }
  func.func @transform_3(%arg0: i32) -> (i32, i32) {
    %c0_i32 = arith.constant 0 : i32
    %c0_i32_0 = arith.constant 0 : i32
    %c0_i32_1 = arith.constant 0 : i32
    return %c0_i32, %c0_i32_0 : i32, i32
  }
  func.func @transform_4(%arg0: i32) -> (i32, i32) {
    %c0_i32 = arith.constant 0 : i32
    %c0_i32_0 = arith.constant 0 : i32
    %c0_i32_1 = arith.constant 0 : i32
    return %c0_i32, %c0_i32_0 : i32, i32
  }
  func.func @transform_5(%arg0: i32) -> (i32, i32) {
    %c0_i32 = arith.constant 0 : i32
    %c0_i32_0 = arith.constant 0 : i32
    %c0_i32_1 = arith.constant 0 : i32
    return %c0_i32, %c0_i32_0 : i32, i32
  }
  func.func @transform_6(%arg0: i32) -> (i32, i32) {
    %c0_i32 = arith.constant 0 : i32
    %c0_i32_0 = arith.constant 0 : i32
    %c0_i32_1 = arith.constant 0 : i32
    return %c0_i32, %c0_i32_0 : i32, i32
  }
  func.func @transform_7(%arg0: i32) -> (i32, i32) {
    %c0_i32 = arith.constant 0 : i32
    %c0_i32_0 = arith.constant 0 : i32
    %c0_i32_1 = arith.constant 0 : i32
    return %c0_i32, %c0_i32_0 : i32, i32
  }
  func.func @transform_8(%arg0: i32) -> (i32, i32) {
    %c0_i32 = arith.constant 0 : i32
    %c0_i32_0 = arith.constant 0 : i32
    %c0_i32_1 = arith.constant 0 : i32
    return %c0_i32, %c0_i32_0 : i32, i32
  }
  func.func @transform_9(%arg0: i32) -> (i32, i32) {
    %c0_i32 = arith.constant 0 : i32
    %c0_i32_0 = arith.constant 0 : i32
    return %arg0, %c0_i32 : i32, i32
  }
}

</mosaic_0001>

<bundles_post_ra>
// kernel: tpu_custom_call.1
= control target key start
LH: loop header
LB: loop body
LE: loop exit
PB: predicated region body
PF: predicated region fallthrough
CT: control target
= control target key end

     0   :  { %14 = vsyncpa [#allocation3], 0  ;;  %s955_s0 = inlined_call_operand.hbm [shape: f32[8,32], index: 0, kind: input, shape index: {}]   ;;  %s956_s1 = inlined_call_operand.hbm [shape: bf16[32,128], index: 1, kind: input, shape index: {}]   ;;  %s957_s2 = inlined_call_operand.vmem [shape: f32[1,128], index: 2, kind: input, shape index: {}]   ;;  %s958_s3 = inlined_call_operand.hbm [shape: bf16[128,128], index: 3, kind: input, shape index: {}]   ;;  %s959_s4 = inlined_call_operand.vmem [shape: f32[1,128], index: 4, kind: input, shape index: {}]   ;;  %s960_s5 = inlined_call_operand.hbm [shape: bf16[128,128], index: 5, kind: input, shape index: {}]   ;;  %s961_s6 = inlined_call_operand.vmem [shape: f32[1,128], index: 6, kind: input, shape index: {}]   ;;  %s962_s7 = inlined_call_operand.hbm [shape: bf16[128,128], index: 7, kind: input, shape index: {}]   ;;  %s963_s8 = inlined_call_operand.vmem [shape: f32[1,128], index: 8, kind: input, shape index: {}]   ;;  %s964_s9 = inlined_call_operand.hbm [shape: f32[8,128], index: 9, kind: output, shape index: {}]  }
   0x1   :  { %15 = vsyncpa [#allocation6], 0 }
   0x2   :  { %16 = vsyncpa [#allocation9], 0 }
   0x3   :  { %17 = vsyncpa [#allocation4], 0  ;;  %s819_s30 = smov [#allocation5]  }
   0x4   :  { %s33_s10 = sshll.u32 %s819_s30, 4  ;;  %s34_s10 = int_to_ptr.vmem [resolvable:$true] %s33_s10 }
   0x5   :  { %s699_s11 = scalar_lea.vmem %s34_s10, 256  ;;  %p704_p1 = scmp.lt.s32.totalorder %s34_s10, %s34_s10 }
   0x6   :  { %p700_p0 = scmp.ne.s32.totalorder %s34_s10, %s699_s11  ;;  %p705_p2 = scmp.lt.s32.totalorder %s699_s11, %s699_s11 }
   0x8   :  { %p706_p3 = por %p705_p2, %p704_p1 }
   0xa   :  { %p707_p4 = pnand %p706_p3, %p700_p0 }
   0xc   :  { %710 = shalt.err (!%p707_p4)
}
   0xd   :  { %s820_s12 = smov 64   ;;  %s821_s13 = smov 4  }
   0xe   :  { %39 = dma.hbm_to_vmem [thread:$0]  %s956_s1, 256, %s34_s10, [#allocation6], %s820_s12, %s820_s12, %s821_s13  }
   0xf   :  { %s822_s16 = smov [#allocation8]   ;;  %s823_s18 = smov [#allocation2]  }
  0x10   :  { %s61_s17 = sshll.u32 %s822_s16, 4  ;;  %s24_s19 = sshll.u32 %s823_s18, 4  ;;  %s62_s17 = int_to_ptr.vmem [resolvable:$true] %s61_s17  ;;  %s25_s19 = int_to_ptr.vmem [resolvable:$true] %s24_s19 }
  0x11   :  { %s719_s20 = scalar_lea.vmem %s62_s17, 1024  ;;  %p724_p6 = scmp.lt.s32.totalorder %s62_s17, %s62_s17 }
  0x12   :  { %p720_p5 = scmp.ne.s32.totalorder %s62_s17, %s719_s20  ;;  %p725_p7 = scmp.lt.s32.totalorder %s719_s20, %s719_s20 }
  0x14   :  { %p726_p8 = por %p725_p7, %p724_p6 }
  0x16   :  { %p727_p9 = pnand %p726_p8, %p720_p5 }
  0x18   :  { %730 = shalt.err (!%p727_p9)
}
  0x19   :  { %67 = dma.hbm_to_vmem [thread:$0]  %s960_s5, 1024, %s62_s17, [#allocation9], %s820_s12, %s820_s12, %s821_s13  }
  0x1a   :  { %s739_s1 = scalar_lea.vmem %s25_s19, 128  ;;  %p744_p11 = scmp.lt.s32.totalorder %s25_s19, %s25_s19 }
  0x1b   :  { %p740_p10 = scmp.ne.s32.totalorder %s25_s19, %s739_s1  ;;  %p745_p12 = scmp.lt.s32.totalorder %s739_s1, %s739_s1 }
  0x1d   :  { %p746_p13 = por %p745_p12, %p744_p11 }
  0x1f   :  { %p747_p0 = pnand %p746_p13, %p740_p10 }
  0x21   :  { %750 = shalt.err (!%p747_p0)
}
  0x22   :  { %27 = dma.hbm_to_vmem [thread:$0]  %s955_s0, 128, %s25_s19, [#allocation3]  }
  0x23   :  { %s824_s25 = smov [#allocation7]   ;;  %s825_s27 = smov [#allocation10]  }
  0x24   :  { %s47_s26 = sshll.u32 %s824_s25, 4  ;;  %s75_s28 = sshll.u32 %s825_s27, 4  ;;  %s48_s26 = int_to_ptr.vmem [resolvable:$true] %s47_s26  ;;  %s76_s28 = int_to_ptr.vmem [resolvable:$true] %s75_s28 }
  0x25   :  { %s759_s29 = scalar_lea.vmem %s48_s26, 1024  ;;  %p764_p2 = scmp.lt.s32.totalorder %s48_s26, %s48_s26 }
  0x26   :  { %p760_p1 = scmp.ne.s32.totalorder %s48_s26, %s759_s29  ;;  %p765_p3 = scmp.lt.s32.totalorder %s759_s29, %s759_s29 }
  0x28   :  { %p766_p4 = por %p765_p3, %p764_p2 }
  0x2a   :  { %p767_p5 = pnand %p766_p4, %p760_p1 }
  0x2c   :  { %770 = shalt.err (!%p767_p5)
}
  0x2d   :  { %53 = dma.hbm_to_vmem [thread:$0]  %s958_s3, 1024, %s48_s26, [#allocation6], %s820_s12, %s820_s12, %s821_s13  }
  0x2e   :  { %s779_s0 = scalar_lea.vmem %s76_s28, 1024  ;;  %p784_p7 = scmp.lt.s32.totalorder %s76_s28, %s76_s28 }
  0x2f   :  { %p780_p6 = scmp.ne.s32.totalorder %s76_s28, %s779_s0  ;;  %p785_p8 = scmp.lt.s32.totalorder %s779_s0, %s779_s0 }
  0x31   :  { %p786_p9 = por %p785_p8, %p784_p7 }
  0x33   :  { %p787_p10 = pnand %p786_p9, %p780_p6 }
  0x35   :  { %790 = shalt.err (!%p787_p10)
}
  0x36   :  { %81 = dma.hbm_to_vmem [thread:$0]  %s962_s7, 1024, %s76_s28, [#allocation9], %s820_s12, %s820_s12, %s821_s13  }
  0x37   :  { %811 = dma.done.wait [#allocation3], 128  }
  0x38   :  { %812 = vsyncadd [#allocation3], 4294967168 }
  0x39   :  { %813 = dma.done.wait [#allocation6], 1280  }
  0x3a   :  { %814 = vsyncadd [#allocation6], 4294966016 }
  0x3b   :  { %815 = dma.done.wait [#allocation9], 2048  }
  0x3c   :  { %816 = vsyncadd [#allocation9], 4294965248  ;;  %v826_v0 = vmov 0.0   ;;  %vm827_vm0 = vmmov 0   ;;  %v665_v1 = vld [vmem:[#allocation5 + $0x8] sm:$0xff]   ;;  %v666_v2 = vld [vmem:[#allocation5] sm:$0xff]  }
  0x3d   :  { %587 = vmatprep.subr.bf16.mxu0 %v826_v0  ;;  %591 = vmatprep.mubr.msk.bf16.mxu0 %vm827_vm0, %v826_v0  ;;  %v100_v3 = vld [vmem:[#allocation2] sm:$0xff]  ;;  %v667_v4 = vld [vmem:[#allocation7 + $0x38] sm:$0xff]   ;;  %v668_v6 = vld [vmem:[#allocation7 + $0x30] sm:$0xff]   ;;  %vm125_vm1 = vcmask 261120   ;;  %s828_s16 = smov [#allocation11]  }
  0x3e   :  { %595 = vmatprep.subr.bf16.mxu1 %v826_v0  ;;  %611 = vmatprep.mubr.msk.bf16.mxu1 %vm827_vm0, %v826_v0  ;;  %v101_v5 = vpack.c.bf16 %v100_v3, %v100_v3  ;;  %v669_v7 = vld [vmem:[#allocation7 + $0x28] sm:$0xff]   ;;  %v670_v8 = vld [vmem:[#allocation7 + $0x20] sm:$0xff]   ;;  %v671_v9 = vld [vmem:[#allocation7 + $0x18] sm:$0xff]   ;;  %s515_s17 = sshll.u32 %s828_s16, 4  ;;  %s516_s17 = int_to_ptr.vmem [resolvable:$true] %s515_s17 }
  0x3f   :  { %588 = vmatpush3.bf16.msra.mxu0 %v665_v1  ;;  %596 = vmatpush3.bf16.msra.mxu1 %v667_v4  ;;  %v672_v10 = vld [vmem:[#allocation7 + $0x10] sm:$0xff]   ;;  %v673_v11 = vld [vmem:[#allocation7 + $0x8] sm:$0xff]   ;;  %v674_v12 = vld [vmem:[#allocation7] sm:$0xff]   ;;  %p796_p12 = scmp.lt.s32.totalorder %s516_s17, %s516_s17 }
  0x40   :  { %589 = vmatprep.subr.bf16.mxu0 %v826_v0  ;;  %597 = vmatprep.subr.bf16.mxu1 %v826_v0  ;;  %v675_v13 = vld [vmem:[#allocation8 + $0x38] sm:$0xff]   ;;  %v676_v14 = vld [vmem:[#allocation8 + $0x30] sm:$0xff]   ;;  %v677_v15 = vld [vmem:[#allocation8 + $0x28] sm:$0xff]  }
  0x41   :  { %v678_v16 = vld [vmem:[#allocation8 + $0x20] sm:$0xff]   ;;  %v679_v17 = vld [vmem:[#allocation8 + $0x18] sm:$0xff]   ;;  %v680_v18 = vld [vmem:[#allocation8 + $0x10] sm:$0xff]  }
  0x42   :  { %v526_v19 = vld [vmem:[%s957_s2] ss:$0 sm:$0xff]  ;;  %v682_v28 = vld [vmem:[#allocation8] sm:$0xff]   ;;  %v683_v29 = vld [vmem:[#allocation10 + $0x38] sm:$0xff]  }
  0x43   :  { %590 = vmatpush3.bf16.msra.mxu0 %v666_v2  ;;  %598 = vmatpush3.bf16.msra.mxu1 %v668_v6  ;;  %v681_v27 = vld [vmem:[#allocation8 + $0x8] sm:$0xff]   ;;  %v684_v30 = vld [vmem:[#allocation10 + $0x30] sm:$0xff]   ;;  %v686_v32 = vld [vmem:[#allocation10 + $0x20] sm:$0xff]  }
  0x44   :  { %615 = vmatprep.subr.bf16.mxu0 %v826_v0  ;;  %599 = vmatprep.subr.bf16.mxu1 %v826_v0  ;;  %v685_v31 = vld [vmem:[#allocation10 + $0x28] sm:$0xff]   ;;  %v687_v33 = vld [vmem:[#allocation10 + $0x18] sm:$0xff]   ;;  %v688_v34 = vld [vmem:[#allocation10 + $0x10] sm:$0xff]  }
  0x45   :  { %v530_v35 = vld [vmem:[%s959_s4] ss:$0 sm:$0xff]  ;;  %v690_v44 = vld [vmem:[#allocation10] sm:$0xff]  }
  0x46   :  { %592 = vmatmul.mubr.msk.bf16.vlgmr.msra.gmra.mxu0 %vm125_vm1, %v101_v5  ;;  %v689_v43 = vld [vmem:[#allocation10 + $0x8] sm:$0xff]  }
  0x47   :  { %631 = vmatprep.mubr.msk.bf16.mxu0 %vm827_vm0, %v826_v0  ;;  %600 = vmatpush3.bf16.msra.mxu1 %v669_v7  ;;  %v539_v45 = vld [vmem:[%s961_s6] ss:$0 sm:$0xff]  ;;  %s791_s6 = scalar_lea.vmem %s516_s17, 128 }
  0x48   :  { %601 = vmatprep.subr.bf16.mxu1 %v826_v0  ;;  %616 = vmatpush3.bf16.msra.mxu0 %v675_v13  ;;  %v548_v53 = vld [vmem:[%s963_s8] ss:$0 sm:$0xff]  ;;  %p792_p11 = scmp.ne.s32.totalorder %s516_s17, %s791_s6  ;;  %p797_p13 = scmp.lt.s32.totalorder %s791_s6, %s791_s6 }
  0x49   :  { %617 = vmatprep.subr.bf16.mxu0 %v826_v0 }
  0x4a   :  { %p798_p0 = por %p797_p13, %p796_p12 }
  0x4b   :  { %602 = vmatpush3.bf16.msra.mxu1 %v670_v8 }
  0x4c   :  { %603 = vmatprep.subr.bf16.mxu1 %v826_v0  ;;  %618 = vmatpush3.bf16.msra.mxu0 %v676_v14  ;;  %p799_p1 = pnand %p798_p0, %p792_p11 }
  0x4d   :  { %619 = vmatprep.subr.bf16.mxu0 %v826_v0 }
  0x4f   :  { %604 = vmatpush3.bf16.msra.mxu1 %v671_v9 }
  0x50   :  { %605 = vmatprep.subr.bf16.mxu1 %v826_v0  ;;  %620 = vmatpush3.bf16.msra.mxu0 %v677_v15 }
  0x51   :  { %621 = vmatprep.subr.bf16.mxu0 %v826_v0 }
  0x53   :  { %606 = vmatpush3.bf16.msra.mxu1 %v672_v10 }
  0x54   :  { %607 = vmatprep.subr.bf16.mxu1 %v826_v0  ;;  %622 = vmatpush3.bf16.msra.mxu0 %v678_v16 }
  0x55   :  { %623 = vmatprep.subr.bf16.mxu0 %v826_v0 }
  0x57   :  { %608 = vmatpush3.bf16.msra.mxu1 %v673_v11 }
  0x58   :  { %609 = vmatprep.subr.bf16.mxu1 %v826_v0  ;;  %624 = vmatpush3.bf16.msra.mxu0 %v679_v17 }
  0x59   :  { %625 = vmatprep.subr.bf16.mxu0 %v826_v0 }
  0x5b   :  { %610 = vmatpush3.bf16.msra.mxu1 %v674_v12 }
  0x5c   :  { %635 = vmatprep.subr.bf16.mxu1 %v826_v0  ;;  %626 = vmatpush3.bf16.msra.mxu0 %v680_v18 }
  0x5d   :  { %627 = vmatprep.subr.bf16.mxu0 %v826_v0 }
  0x60   :  { %628 = vmatpush3.bf16.msra.mxu0 %v681_v27 }
  0x61   :  { %629 = vmatprep.subr.bf16.mxu0 %v826_v0 }
  0x64   :  { %630 = vmatpush3.bf16.msra.mxu0 %v682_v28 }
 0x106   :  { %v163_v20 = vpop.f32.mrf.mxu0 }
 0x107   :  { %v164_v21 = vadd.f32 %v526_v19, %v163_v20 }
 0x108   :  { %v593_v22 = vpop.f32.mrf.mxu0 }
 0x109   :  { %v169_v23 = vmax.f32 %v164_v21, 0.0 }
 0x10a   :  { %v166_v24 = vpop.f32.mrf.mxu0 }
 0x10b   :  { %v170_v25 = vpack.c.bf16 %v169_v23, %v169_v23 }
 0x10c   :  { %v594_v26 = vpop.f32.mrf.mxu0 }
 0x10d   :  { %612 = vmatmul.mubr.bf16.vlgmr.msra.gmra.mxu1 %v170_v25 }
 0x10e   :  { %651 = vmatprep.mubr.msk.bf16.mxu1 %vm827_vm0, %v826_v0  ;;  %636 = vmatpush3.bf16.msra.mxu1 %v683_v29 }
 0x10f   :  { %637 = vmatprep.subr.bf16.mxu1 %v826_v0 }
 0x112   :  { %638 = vmatpush3.bf16.msra.mxu1 %v684_v30 }
 0x113   :  { %639 = vmatprep.subr.bf16.mxu1 %v826_v0 }
 0x116   :  { %640 = vmatpush3.bf16.msra.mxu1 %v685_v31 }
 0x117   :  { %641 = vmatprep.subr.bf16.mxu1 %v826_v0 }
 0x11a   :  { %642 = vmatpush3.bf16.msra.mxu1 %v686_v32 }
 0x11b   :  { %643 = vmatprep.subr.bf16.mxu1 %v826_v0 }
 0x11e   :  { %644 = vmatpush3.bf16.msra.mxu1 %v687_v33 }
 0x11f   :  { %645 = vmatprep.subr.bf16.mxu1 %v826_v0 }
 0x122   :  { %646 = vmatpush3.bf16.msra.mxu1 %v688_v34 }
 0x123   :  { %647 = vmatprep.subr.bf16.mxu1 %v826_v0 }
 0x126   :  { %648 = vmatpush3.bf16.msra.mxu1 %v689_v43 }
 0x127   :  { %649 = vmatprep.subr.bf16.mxu1 %v826_v0 }
 0x12a   :  { %650 = vmatpush3.bf16.msra.mxu1 %v690_v44 }
 0x1cd   :  { %v276_v36 = vpop.f32.mrf.mxu1 }
 0x1ce   :  { %v277_v37 = vadd.f32 %v530_v35, %v276_v36 }
 0x1cf   :  { %v613_v38 = vpop.f32.mrf.mxu1 }
 0x1d0   :  { %v282_v39 = vmax.f32 %v277_v37, 0.0 }
 0x1d1   :  { %v279_v40 = vpop.f32.mrf.mxu1 }
 0x1d2   :  { %v283_v41 = vpack.c.bf16 %v282_v39, %v282_v39 }
 0x1d3   :  { %v614_v42 = vpop.f32.mrf.mxu1 }
 0x1d4   :  { %632 = vmatmul.mubr.bf16.vlgmr.msra.gmra.mxu0 %v283_v41 }
 0x294   :  { %v389_v46 = vpop.f32.mrf.mxu0 }
 0x295   :  { %v390_v47 = vadd.f32 %v539_v45, %v389_v46 }
 0x296   :  { %v633_v48 = vpop.f32.mrf.mxu0 }
 0x297   :  { %v395_v49 = vmax.f32 %v390_v47, 0.0 }
 0x298   :  { %v392_v50 = vpop.f32.mrf.mxu0 }
 0x299   :  { %v396_v51 = vpack.c.bf16 %v395_v49, %v395_v49 }
 0x29a   :  { %v634_v52 = vpop.f32.mrf.mxu0 }
 0x29b   :  { %652 = vmatmul.mubr.bf16.vlgmr.msra.gmra.mxu1 %v396_v51 }
 0x35b   :  { %v502_v54 = vpop.f32.mrf.mxu1 }
 0x35c   :  { %v503_v55 = vadd.f32 %v548_v53, %v502_v54 }
 0x35d   :  { %v653_v56 = vpop.f32.mrf.mxu1 }
 0x35e   :  { %508 = vst [vmem:[#allocation11] sm:$0xff] %v503_v55 }
 0x35f   :  { %v505_v57 = vpop.f32.mrf.mxu1 }
 0x360   :  { %802 = shalt.err (!%p799_p1)
}
 0x361   :  { %518 = dma.vmem_to_hbm [thread:$0]  %s516_s17, 128, %s964_s9, [#allocation4]   ;;  %v654_v58 = vpop.f32.mrf.mxu1 }
 0x362   :  { %817 = dma.done.wait [#allocation4], 128  }
 0x363   :  { %818 = vsyncadd [#allocation4], 4294967168 }
 0x364   :  { %522 = vsyncpa [#allocation3], 1 }
 0x365   :  { %523 = vsyncpa [#allocation6], 1 }
 0x366   :  { %524 = vsyncpa [#allocation9], 1 }
 0x367   :  { %525 = vsyncpa [#allocation4], 1 }

</bundles_post_ra>
